<compile_context>
chip_gen: v7x
topology: tpu7x:2x2x1
jax: 0.10.0
libtpu: 0.0.40
codegen_flags: <defaults>
</compile_context>

<pallas_src>
import jax
import jax.numpy as jnp
from jax.experimental import pallas as pl
from jax.experimental.pallas import tpu as pltpu


# -------------------------- Pallas kernel --------------------------

def _relu_kernel(x_ref, o_ref):
    x = x_ref[...]
    # Keep where(x > 0, x, 0) (not maximum) to preserve exact torch.where
    # semantics, including NaN -> 0. Kernel is DMA/HBM-bound; VPU has slack.
    o_ref[...] = jnp.where(x > 0, x.astype(jnp.float32),
                           jnp.zeros_like(x, dtype=jnp.float32))


# -------------------------- chip / shape heuristics --------------------------

def _chip_config():
    """Returns (num_tensorcores, row_block_max_at_1024_lanes, vmem_limit_bytes)."""
    kind = ""
    try:
        kind = jax.devices()[0].device_kind.lower()
    except Exception:
        pass
    if "v7" in kind:
        # 2 TCs/chip, 64 MiB physical VMEM per TC: 4 MiB blocks, 32 MiB limit.
        return 2, 1024, 32 * 1024 * 1024
    if "v5" in kind or "v6" in kind:
        # 1 TC, 128 MiB VMEM: bigger blocks amortize per-grid-step overhead.
        return 1, 2048, 48 * 1024 * 1024
    # Unknown / other generation: conservative (v7x-safe) settings.
    return 2, 1024, 32 * 1024 * 1024


def _pick_lanes(total):
    """Largest lane-dense width (multiple of 128) that divides `total`."""
    for lanes in (1024, 512, 256, 128):
        if total % lanes == 0:
            return lanes
    return 128  # will require (minimal) padding


# -------------------------- wrapper --------------------------

def relu_pallas(x: jax.Array) -> jax.Array:
    """ReLU.forward: returns float32 tensor with the same shape as x."""
    orig_shape = x.shape
    total = x.size
    num_tc, row_block_max_1024, vmem_limit = _chip_config()

    flat = x.reshape(-1)
    lanes = _pick_lanes(total)
    padded_total = pl.cdiv(total, lanes) * lanes
    pad = padded_total - total
    if pad:
        # Rare path: total not a multiple of 128. Pad only to 128 granularity.
        flat = jnp.pad(flat, (0, pad))
    rows = padded_total // lanes
    x2d = flat.reshape(rows, lanes)

    # Keep a constant per-block byte budget when lanes shrink below 1024.
    row_block_max = row_block_max_1024 * (1024 // lanes)

    # Sublane packing of the *input* dtype (f32->8, bf16->16, int8/fp8->32);
    # the f32 output side is satisfied by any multiple of 8.
    itemsize = jnp.dtype(x.dtype).itemsize
    sub = max(8, 32 // max(1, itemsize))

    if num_tc > 1 and rows > sub:
        # 2-TC chips (v7x): split so both TensorCores get equal work, and keep
        # the grid-step count a multiple of num_tc whenever grid > 1.
        half = sub * pl.cdiv(pl.cdiv(rows, num_tc), sub)
        block_rows = min(row_block_max, half)
        grid_n = pl.cdiv(rows, block_rows)
        if grid_n > 1 and grid_n % num_tc:
            target = num_tc * pl.cdiv(grid_n, num_tc)
            block_rows = sub * pl.cdiv(pl.cdiv(rows, target), sub)
            grid_n = pl.cdiv(rows, block_rows)
    else:
        # Single-TC chips (v5e/v6e), or tiny inputs: one long DMA per block,
        # never split just for megacore's sake.
        block_rows = rows if rows <= row_block_max else row_block_max
        grid_n = pl.cdiv(rows, block_rows)

    out2d = pl.pallas_call(
        _relu_kernel,
        out_shape=jax.ShapeDtypeStruct((rows, lanes), jnp.float32),
        grid_spec=pltpu.PrefetchScalarGridSpec(
            num_scalar_prefetch=0,
            grid=(grid_n,),
            in_specs=[pl.BlockSpec((block_rows, lanes), lambda i: (i, 0))],
            out_specs=pl.BlockSpec((block_rows, lanes), lambda i: (i, 0)),
        ),
        compiler_params=pltpu.CompilerParams(
            dimension_semantics=("parallel",),
            vmem_limit_bytes=vmem_limit,
        ),
    )(x2d)

    out_flat = out2d.reshape(-1)
    if pad:
        out_flat = out_flat[:total]
    return out_flat.reshape(orig_shape)


# -------------------------- demo / check --------------------------

def _ref_relu(x):
    return jnp.where(x > 0, x.astype(jnp.float32),
                     jnp.zeros(x.shape, jnp.float32))


if __name__ == "__main__":
    key = jax.random.PRNGKey(0)
    k1, k2, k3, k4 = jax.random.split(key, 4)

    # Primary small NCHW-style input (total = 2048 -> (2, 1024), no padding).
    x = jax.random.normal(k1, (2, 4, 16, 16), dtype=jnp.float32)
    out = relu_pallas(x)
    jax.block_until_ready(out)
    assert out.shape == x.shape and out.dtype == jnp.float32
    assert jnp.allclose(out, _ref_relu(x)), "mismatch vs reference (main)"

    # Larger aligned input (total = 32768 -> rows=32; split only on 2-TC chips).
    x2 = jax.random.normal(k2, (4, 8, 32, 32), dtype=jnp.float32)
    out2 = relu_pallas(x2)
    jax.block_until_ready(out2)
    assert jnp.allclose(out2, _ref_relu(x2)), "mismatch vs reference (tiled)"

    # Ragged size (1155 elements) exercising the rare minimal-pad path.
    x3 = jax.random.normal(k3, (3, 5, 7, 11), dtype=jnp.float32)
    out3 = relu_pallas(x3)
    jax.block_until_ready(out3)
    assert jnp.allclose(out3, _ref_relu(x3)), "mismatch vs reference (ragged)"

    # Narrow-dtype input (bf16 -> f32 output), exercising the sublane rounding.
    x4 = jax.random.normal(k4, (2, 4, 16, 16), dtype=jnp.bfloat16)
    out4 = relu_pallas(x4)
    jax.block_until_ready(out4)
    assert out4.dtype == jnp.float32
    assert jnp.allclose(out4, _ref_relu(x4)), "mismatch vs reference (bf16)"

    print("KERNEL_OK")
</pallas_src>

<mosaic_0001>
module attributes {stable_mosaic.version = 11 : i64} {
  func.func @_relu_kernel(%arg0: i32, %arg1: memref<2x1024xf32, #tpu.memory_space<vmem>>, %arg2: memref<2x1024xf32, #tpu.memory_space<vmem>>) attributes {dimension_semantics = [#tpu.dimension_semantics<parallel>], iteration_bounds = array<i64: 1>, scalar_prefetch = 0 : i64, scratch_operands = 0 : i64, tpu.core_type = #tpu.core_type<tc>, window_params = [{transform_indices = @transform_0, window_bounds = array<i64: 2, 1024>}, {transform_indices = @transform_1, window_bounds = array<i64: 2, 1024>}]} {
    %c0 = arith.constant 0 : index
    %c0_0 = arith.constant 0 : index
    %0 = vector.load %arg1[%c0, %c0_0] : memref<2x1024xf32, #tpu.memory_space<vmem>>, vector<2x1024xf32>
    %cst = arith.constant 0.000000e+00 : f32
    %1 = vector.broadcast %cst : f32 to vector<2x1024xf32>
    %2 = arith.cmpf ogt, %0, %1 : vector<2x1024xf32>
    %cst_1 = arith.constant 0.000000e+00 : f32
    %3 = vector.broadcast %cst_1 : f32 to vector<2x1024xf32>
    %4 = arith.select %2, %0, %3 : vector<2x1024xi1>, vector<2x1024xf32>
    %c0_2 = arith.constant 0 : index
    %c0_3 = arith.constant 0 : index
    %5 = vector.load %arg2[%c0_2, %c0_3] : memref<2x1024xf32, #tpu.memory_space<vmem>>, vector<2x1024xf32>
    tpu.vector_store %arg2[%c0_2, %c0_3], %4 {strides = array<i32>} : memref<2x1024xf32, #tpu.memory_space<vmem>>, vector<2x1024xf32>,
    return
  }
  func.func @transform_0(%arg0: i32) -> (i32, i32) {
    %c0_i32 = arith.constant 0 : i32
    %c0_i32_0 = arith.constant 0 : i32
    return %arg0, %c0_i32 : i32, i32
  }
  func.func @transform_1(%arg0: i32) -> (i32, i32) {
    %c0_i32 = arith.constant 0 : i32
    %c0_i32_0 = arith.constant 0 : i32
    return %arg0, %c0_i32 : i32, i32
  }
}

</mosaic_0001>

<bundles_post_ra>
// kernel: tpu_custom_call.1
= control target key start
LH: loop header
LB: loop body
LE: loop exit
PB: predicated region body
PF: predicated region fallthrough
CT: control target
= control target key end

     0   :  { %6 = vsyncpa [#allocation3], 0  ;;  %s130_s0 = inlined_call_operand.hbm [shape: f32[2,1024], index: 0, kind: input, shape index: {}]   ;;  %s131_s1 = inlined_call_operand.hbm [shape: f32[2,1024], index: 1, kind: output, shape index: {}]  }
   0x1   :  { %7 = vsyncpa [#allocation4], 0  ;;  %s94_s6 = smov [#allocation2]   ;;  %s46_s10 = scalar_lea.hbm %s130_s0, 256 }
   0x2   :  { %s14_s7 = sshll.u32 %s94_s6, 4  ;;  %p47_p0 = scmp.ne.s32.totalorder %s130_s0, %s46_s10  ;;  %s15_s7 = int_to_ptr.vmem [resolvable:$true] %s14_s7 }
   0x3   :  { %p50_p1 = scmp.lt.u32.totalorder %s46_s10, %s130_s0 }
   0x5   :  { %p52_p2 = pnand %p50_p1, %p47_p0 }
   0x7   :  { %55 = shalt.err (!%p52_p2)
}
   0x8   :  { %s56_s15 = scalar_lea.vmem %s15_s7, 256  ;;  %p61_p4 = scmp.lt.s32.totalorder %s15_s7, %s15_s7 }
   0x9   :  { %p57_p3 = scmp.ne.s32.totalorder %s15_s7, %s56_s15  ;;  %p62_p5 = scmp.lt.s32.totalorder %s56_s15, %s56_s15 }
   0xb   :  { %p63_p6 = por %p62_p5, %p61_p4 }
   0xd   :  { %p64_p7 = pnand %p63_p6, %p57_p3 }
   0xf   :  { %67 = shalt.err (!%p64_p7)
}
  0x10   :  { %17 = dma.hbm_to_vmem [thread:$0]  %s130_s0, 256, %s15_s7, [#allocation3]  }
  0x11   :  { %90 = dma.done.wait [#allocation3], 256  }
  0x12   :  { %91 = vsyncadd [#allocation3], 4294967040  ;;  %s95_s18 = smov [#allocation5]   ;;  %v21_v0 = vld [vmem:[#allocation2] sm:$0xff]  ;;  %v22_v1 = vld [vmem:[#allocation2 + $0x8] sm:$0xff] }
  0x13   :  { %s35_s19 = sshll.u32 %s95_s18, 4  ;;  %vm23_vm0 = vcmp.gt.f32.partialorder %v21_v0, 0.0  ;;  %vm24_vm1 = vcmp.gt.f32.partialorder %v22_v1, 0.0  ;;  %s36_s19 = int_to_ptr.vmem [resolvable:$true] %s35_s19 }
  0x14   :  { %v25_v2 = vsel %vm23_vm0, %v21_v0, 0.0  ;;  %v26_v3 = vsel %vm24_vm1, %v22_v1, 0.0  ;;  %s68_s20 = scalar_lea.vmem %s36_s19, 256  ;;  %p73_p9 = scmp.lt.s32.totalorder %s36_s19, %s36_s19 }
  0x15   :  { %27 = vst [vmem:[#allocation5] sm:$0xff] %v25_v2  ;;  %28 = vst [vmem:[#allocation5 + $0x8] sm:$0xff] %v26_v3  ;;  %p69_p8 = scmp.ne.s32.totalorder %s36_s19, %s68_s20  ;;  %p74_p10 = scmp.lt.s32.totalorder %s68_s20, %s68_s20 }
  0x17   :  { %p75_p11 = por %p74_p10, %p73_p9 }
  0x19   :  { %p76_p12 = pnand %p75_p11, %p69_p8 }
  0x1b   :  { %79 = shalt.err (!%p76_p12)
}
  0x1c   :  { %s80_s22 = scalar_lea.hbm %s131_s1, 256 }
  0x1d   :  { %p81_p13 = scmp.ne.s32.totalorder %s131_s1, %s80_s22  ;;  %p84_p0 = scmp.lt.u32.totalorder %s80_s22, %s131_s1 }
  0x1f   :  { %p86_p1 = pnand %p84_p0, %p81_p13 }
  0x21   :  { %89 = shalt.err (!%p86_p1)
}
  0x22   :  { %38 = dma.vmem_to_hbm [thread:$0]  %s36_s19, 256, %s131_s1, [#allocation4]  }
  0x23   :  { %92 = dma.done.wait [#allocation4], 256  }
  0x24   :  { %93 = vsyncadd [#allocation4], 4294967040 }
  0x25   :  { %42 = vsyncpa [#allocation3], 1 }
  0x26   :  { %43 = vsyncpa [#allocation4], 1 }

</bundles_post_ra>
